<compile_context>
chip_gen: v7x
topology: tpu7x:2x2x1
jax: 0.10.0
libtpu: 0.0.40
codegen_flags: <defaults>
</compile_context>

<pallas_src>
from functools import partial

import jax
import jax.numpy as jnp
from jax.experimental import pallas as pl
from jax.experimental.pallas import tpu as pltpu


def _round_up(x, m):
    return ((x + m - 1) // m) * m


def _msblock_kernel(x_ref, w_ref, aux_ref, o_ref, lhs_ref, *, L, D, H):
    """One batch-tile per grid step.

    x_ref  : (Bt, Ltot, Cin)  channels-last activations, zero halo of D rows each side
                              plus tail alignment rows (compute dtype)
    w_ref  : (K, Cp)          fused conv weight (BN + dilation-mix folded, Cout lane-padded)
    aux_ref: (2H+3, Cp)       f32 constants: [0:H]=fc1w^T, [H:2H]=fc2w, [2H]=conv bias,
                              [2H+1]=fc2b, [2H+2]=fc1b (zero padded)
    o_ref  : (Bt, Lpad, Cp)   lane-dense output (compute dtype)
    lhs_ref: (Bt, Lpad, K)    VMEM scratch for the in-kernel tap unfold
    """
    Bt, Lpad, Cp = o_ref.shape
    Cin = x_ref.shape[-1]
    K = lhs_ref.shape[-1]

    # In-VMEM tap unfold (im2col over the 3 taps of every dilation + the 1x1 branch):
    # static shifted-window copies from the halo'd tile -- cheap VMEM traffic, no HBM blowup.
    offs = [D + (k - 1) * d for d in range(1, D + 1) for k in range(3)] + [D]
    for t, off in enumerate(offs):
        lhs_ref[:, :, t * Cin:(t + 1) * Cin] = x_ref[:, off:off + Lpad, :]

    # Fused (3D+1)-tap conv over all dilations: ONE big-K MXU matmul, f32 accumulate.
    acc = jnp.dot(lhs_ref[...].reshape(Bt * Lpad, K), w_ref[...],
                  preferred_element_type=jnp.float32)                        # (Bt*Lpad, Cp)
    bias = aux_ref[2 * H:2 * H + 1, :]                                        # (1, Cp)
    r = jnp.maximum(acc + bias, 0.0).reshape(Bt, Lpad, Cp)                    # ReLU

    # Squeeze-and-excite: true-length mean over L (alignment-padded rows excluded),
    # 2-layer MLP, sigmoid gate.  All epilogue math in f32.
    m = jnp.sum(r[:, :L, :], axis=1) * (1.0 / L)                              # (Bt, Cp)
    fc1w_t = aux_ref[0:H, :]                                                  # (H, Cp) = fc1w^T
    fc2w = aux_ref[H:2 * H, :]                                                # (H, Cp)
    fc1b = aux_ref[2 * H + 2:2 * H + 3, 0:H]                                  # (1, H)
    fc2b = aux_ref[2 * H + 1:2 * H + 2, :]                                    # (1, Cp)
    h = jnp.maximum(
        jax.lax.dot_general(m, fc1w_t, (((1,), (1,)), ((), ())),
                            preferred_element_type=jnp.float32) + fc1b, 0.0)  # (Bt, H)
    s = jax.nn.sigmoid(jnp.dot(h, fc2w, preferred_element_type=jnp.float32) + fc2b)  # (Bt, Cp)

    # TODO(synk): train-mode Dropout(0.6) not implemented (eval-mode identity used).
    o_ref[...] = (r * s[:, None, :]).astype(o_ref.dtype)


def init_params(key, Cin, Cout, D, r=16):
    """Deterministic synthetic parameters, with eval-mode BatchNorm folded into the convs."""
    eps = 1e-5
    ks = list(jax.random.split(key, 32))
    nxt = iter(ks)
    hidden = Cout // r

    def bn_fold(cw, cb, k_bnw, k_bnb):
        # Eval-mode BN folded with its running stats (fresh BatchNorm1d: mean=0, var=1).
        bnw = 1.0 + 0.1 * jax.random.normal(k_bnw, (Cout,), jnp.float32)
        bnb = 0.1 * jax.random.normal(k_bnb, (Cout,), jnp.float32)
        rmean = jnp.zeros((Cout,), jnp.float32)
        rvar = jnp.ones((Cout,), jnp.float32)
        scale = bnw / jnp.sqrt(rvar + eps)
        return cw * scale[:, None, None], (cb - rmean) * scale + bnb

    w3_eff, b3_eff = [], []
    for _ in range(D):
        cw = 0.3 * jax.random.normal(next(nxt), (Cout, Cin, 3), jnp.float32)
        cb = 0.1 * jax.random.normal(next(nxt), (Cout,), jnp.float32)
        w, b = bn_fold(cw, cb, next(nxt), next(nxt))
        w3_eff.append(w)
        b3_eff.append(b)

    cw1 = 0.3 * jax.random.normal(next(nxt), (Cout, Cin, 1), jnp.float32)
    cb1 = 0.1 * jax.random.normal(next(nxt), (Cout,), jnp.float32)
    w1_eff, b1_eff = bn_fold(cw1, cb1, next(nxt), next(nxt))

    return {
        "D": D, "Cin": Cin, "Cout": Cout, "hidden": hidden,
        "w3_eff": jnp.stack(w3_eff),               # (D, Cout, Cin, 3)
        "b3_eff": jnp.stack(b3_eff),               # (D, Cout)
        "w1_eff": w1_eff,                          # (Cout, Cin, 1)
        "b1_eff": b1_eff,                          # (Cout,)
        "dilation_weighting": jax.random.normal(next(nxt), (1, 1, 1, D + 1), jnp.float32),
        "key_strength": jax.random.normal(next(nxt), (1,), jnp.float32),
        "gamma": jax.random.normal(next(nxt), (1,), jnp.float32),
        "fc1w": 0.3 * jax.random.normal(next(nxt), (Cout, hidden), jnp.float32),
        "fc1b": 0.1 * jax.random.normal(next(nxt), (hidden,), jnp.float32),
        "fc2w": 0.3 * jax.random.normal(next(nxt), (hidden, Cout), jnp.float32),
        "fc2b": 0.1 * jax.random.normal(next(nxt), (Cout,), jnp.float32),
    }


def compute_mix_weights(p):
    """Scalar mixing-weight math from MultiScaleBlock.forward (tiny; plain JAX)."""
    beta = jnp.log(jnp.exp(p["key_strength"]) + 1.0)          # softplus
    w = jax.nn.softmax(p["dilation_weighting"] * beta, axis=-1)
    gamma = jnp.log(jnp.exp(p["gamma"]) + 1.0) + 1.0           # modified softplus
    w = w ** gamma
    w = w / jnp.sum(w, axis=-1, keepdims=True)
    return w.reshape(1, -1).astype(jnp.float32)                # (1, D+1)


def multiscale_forward(x_bcl, p, compute_dtype=jnp.bfloat16, channels_last=False):
    """x_bcl: (B, Cin, L) like PyTorch.  Returns ((B, Cout, L) [or (B, L, Cout)], wmix)."""
    B, Cin, L = x_bcl.shape
    D, Cout, H = p["D"], p["Cout"], p["hidden"]
    T = 3 * D + 1
    K = T * Cin
    Cp = _round_up(Cout, 128)                                  # lane-dense output width
    itemsize = jnp.dtype(compute_dtype).itemsize
    sub = 32 // itemsize                                       # sublane tile: 8 (f32) / 16 (bf16)
    Lpad = _round_up(L, sub)                                   # aligned per-sample row count
    Ltot = _round_up(Lpad + 2 * D, sub)                        # halo'd + aligned input length

    wmix = compute_mix_weights(p)                              # (1, D+1)
    wv = wmix[0]

    # Fold dilation-mix weights (BN already folded in init) into one conv weight + one bias.
    blocks = []
    for d in range(1, D + 1):
        for k in range(3):
            blocks.append(wv[d - 1] * p["w3_eff"][d - 1][:, :, k].T)   # (Cin, Cout)
    blocks.append(wv[D] * p["w1_eff"][:, :, 0].T)
    w_fused = jnp.concatenate(blocks, axis=0)                          # (K, Cout)
    bias = jnp.sum(wv[:D, None] * p["b3_eff"], axis=0) + wv[D] * p["b1_eff"]
    w_fused = jnp.pad(w_fused, ((0, 0), (0, Cp - Cout))).astype(compute_dtype)

    # Pack all small constants into one f32 tensor (one DMA, no tiny-tile padding).
    aux = jnp.concatenate(
        [jnp.pad(p["fc1w"].T, ((0, 0), (0, Cp - Cout))),               # (H, Cp) = fc1w^T
         jnp.pad(p["fc2w"], ((0, 0), (0, Cp - Cout))),                 # (H, Cp)
         jnp.pad(bias, (0, Cp - Cout))[None],
         jnp.pad(p["fc2b"], (0, Cp - Cout))[None],
         jnp.pad(p["fc1b"], (0, Cp - H))[None]], axis=0).astype(jnp.float32)  # (2H+3, Cp)

    # Channels-last activations cast to the compute dtype BEFORE any padding/blowup.
    xcl = jnp.transpose(x_bcl, (0, 2, 1)).astype(compute_dtype)        # (B, L, Cin)

    # Generation-aware batch tiling (M = Bt*Lpad rows per step).
    def vmem_bytes(bt):
        m = bt * Lpad
        return (2 * bt * Ltot * max(Cin, 128) * itemsize       # x tile (double-buffered)
                + 2 * m * Cp * itemsize                         # out tile (double-buffered)
                + m * _round_up(K, 128) * itemsize              # lhs unfold scratch
                + 2 * m * Cp * 4                                # f32 acc / gated temporaries
                + _round_up(K, sub) * Cp * itemsize             # fused weight (single-buffered)
                + _round_up(2 * H + 3, 8) * Cp * 4)             # aux constants (single-buffered)

    # Split into 2 steps only when each step still presents >= 512 MXU rows (v7x 2-TC win);
    # single-TC v5e/v6e small problems stay at one grid step (no per-step fixed overhead).
    n_target = 2 if B * Lpad >= 1024 else 1
    Bt = -(-B // n_target)
    VMEM_TARGET = 24 << 20                                     # headroom for v7x's 64 MiB VMEM
    while Bt > 1 and vmem_bytes(Bt) > VMEM_TARGET:
        Bt = -(-Bt // 2)
    n_steps = -(-B // Bt)
    Bpad = Bt * n_steps
    # TODO(synk): for a single very long sequence (Bt==1 still over budget), add an L-tile
    # grid axis with a halo and carry the SE mean across tiles (two-phase gating).

    x_p = jnp.pad(xcl, ((0, Bpad - B), (D, Ltot - L - D), (0, 0)))     # (Bpad, Ltot, Cin)

    vmem_limit = int(min(max(vmem_bytes(Bt) * 1.75 + (8 << 20), 24 << 20), 64 << 20))
    cost = pl.CostEstimate(
        flops=2 * Bpad * Lpad * K * Cp + 4 * Bpad * Cp * H,
        transcendentals=Bpad * Cp,
        bytes_accessed=(x_p.size * itemsize + w_fused.size * itemsize
                        + aux.size * 4 + Bpad * Lpad * Cp * itemsize))

    kernel = partial(_msblock_kernel, L=L, D=D, H=H)
    out = pl.pallas_call(
        kernel,
        out_shape=jax.ShapeDtypeStruct((Bpad, Lpad, Cp), compute_dtype),
        grid_spec=pltpu.PrefetchScalarGridSpec(
            num_scalar_prefetch=0,
            grid=(n_steps,),
            in_specs=[
                pl.BlockSpec((Bt, Ltot, Cin), lambda i: (i, 0, 0)),
                pl.BlockSpec((K, Cp), lambda i: (0, 0),
                             pipeline_mode=pl.Buffered(1)),      # resident weight: 1 buffer
                pl.BlockSpec((2 * H + 3, Cp), lambda i: (0, 0),
                             pipeline_mode=pl.Buffered(1)),      # resident constants: 1 buffer
            ],
            out_specs=pl.BlockSpec((Bt, Lpad, Cp), lambda i: (i, 0, 0)),
            scratch_shapes=[pltpu.VMEM((Bt, Lpad, K), compute_dtype)],
        ),
        compiler_params=pltpu.CompilerParams(
            dimension_semantics=("parallel",),
            vmem_limit_bytes=vmem_limit),
        cost_estimate=cost,
    )(x_p, w_fused, aux)

    out = out[:B, :L, :Cout]                                    # drop batch/row/lane padding
    if channels_last:
        return out, wmix                                        # (B, L, Cout): no extra HBM pass
    return jnp.transpose(out, (0, 2, 1)), wmix                  # PyTorch layout (B, Cout, L)


def reference(x_bcl, p, wmix):
    """Pure-JAX reference mirroring the PyTorch forward (eval mode), f32 throughout."""
    D = p["D"]
    ys = []
    for d in range(1, D + 1):
        y = jax.lax.conv_general_dilated(
            x_bcl, p["w3_eff"][d - 1], window_strides=(1,), padding=[(d, d)],
            rhs_dilation=(d,), dimension_numbers=("NCH", "OIH", "NCH"))
        ys.append(y + p["b3_eff"][d - 1][None, :, None])
    y = jax.lax.conv_general_dilated(
        x_bcl, p["w1_eff"], window_strides=(1,), padding=[(0, 0)],
        dimension_numbers=("NCH", "OIH", "NCH"))
    ys.append(y + p["b1_eff"][None, :, None])
    st = jnp.stack(ys, axis=-1)                                # (B, Cout, L, D+1)
    out = jnp.sum(st * wmix.reshape(1, 1, 1, -1), axis=-1)
    out = jnp.maximum(out, 0.0)
    m = out.mean(-1)                                           # (B, Cout)
    h = jnp.maximum(m @ p["fc1w"] + p["fc1b"], 0.0)
    s = jax.nn.sigmoid(h @ p["fc2w"] + p["fc2b"])
    return out * s[:, :, None]


if __name__ == "__main__":
    B, Cin, Cout, L, D = 2, 16, 32, 16, 3
    key = jax.random.PRNGKey(0)
    kx, kp = jax.random.split(key)
    x = jax.random.normal(kx, (B, Cin, L), jnp.float32)
    params = init_params(kp, Cin, Cout, D, r=16)

    # Strict check: f32 kernel path vs PyTorch-mirror reference (folding only reorders sums).
    out32, wmix = multiscale_forward(x, params, compute_dtype=jnp.float32)
    out32 = jax.block_until_ready(out32)
    ref = reference(x, params, wmix)
    assert out32.shape == (B, Cout, L), out32.shape
    err32 = float(jnp.max(jnp.abs(out32.astype(jnp.float32) - ref)))
    if err32 > 2e-3:
        raise SystemExit(f"f32 numerical mismatch vs reference: max abs err = {err32}")

    # Default perf path (bf16 activations/weights/output, f32 accumulate): bf16 tolerance.
    out16, _ = multiscale_forward(x, params, compute_dtype=jnp.bfloat16)
    out16 = jax.block_until_ready(out16)
    err16 = float(jnp.max(jnp.abs(out16.astype(jnp.float32) - ref)))
    tol16 = 2e-2 * max(1.0, float(jnp.max(jnp.abs(ref))))
    if err16 > tol16:
        raise SystemExit(f"bf16 numerical mismatch vs reference: {err16} > tol {tol16}")

    print("KERNEL_OK")
</pallas_src>

<mosaic_0001>
module attributes {stable_mosaic.version = 11 : i64} {
  func.func @_msblock_kernel(%arg0: i32, %arg1: memref<2x24x16xf32, #tpu.memory_space<vmem>>, %arg2: memref<160x128xf32, #tpu.memory_space<vmem>>, %arg3: memref<7x128xf32, #tpu.memory_space<vmem>>, %arg4: memref<2x16x128xf32, #tpu.memory_space<vmem>>, %arg5: memref<2x16x160xf32, #tpu.memory_space<vmem>>) attributes {dimension_semantics = [#tpu.dimension_semantics<parallel>], iteration_bounds = array<i64: 1>, scalar_prefetch = 0 : i64, scratch_operands = 1 : i64, tpu.core_type = #tpu.core_type<tc>, window_params = [{transform_indices = @transform_0, window_bounds = array<i64: 2, 24, 16>}, {pipeline_mode = #tpu.pipeline_mode<synchronous>, transform_indices = @transform_1, window_bounds = array<i64: 160, 128>}, {pipeline_mode = #tpu.pipeline_mode<synchronous>, transform_indices = @transform_2, window_bounds = array<i64: 7, 128>}, {transform_indices = @transform_3, window_bounds = array<i64: 2, 16, 128>}]} {
    %c0 = arith.constant 0 : index
    %c2 = arith.constant 2 : index
    %c0_0 = arith.constant 0 : index
    %0 = vector.load %arg1[%c0, %c2, %c0_0] : memref<2x24x16xf32, #tpu.memory_space<vmem>>, vector<2x16x16xf32>
    %c0_1 = arith.constant 0 : index
    %c0_2 = arith.constant 0 : index
    %c0_3 = arith.constant 0 : index
    %1 = vector.load %arg5[%c0_1, %c0_2, %c0_3] : memref<2x16x160xf32, #tpu.memory_space<vmem>>, vector<2x16x16xf32>
    tpu.vector_store %arg5[%c0_1, %c0_2, %c0_3], %0 {strides = array<i32>} : memref<2x16x160xf32, #tpu.memory_space<vmem>>, vector<2x16x16xf32>,
    %c0_4 = arith.constant 0 : index
    %c3 = arith.constant 3 : index
    %c0_5 = arith.constant 0 : index
    %2 = vector.load %arg1[%c0_4, %c3, %c0_5] : memref<2x24x16xf32, #tpu.memory_space<vmem>>, vector<2x16x16xf32>
    %c0_6 = arith.constant 0 : index
    %c0_7 = arith.constant 0 : index
    %c16 = arith.constant 16 : index
    %3 = vector.load %arg5[%c0_6, %c0_7, %c16] : memref<2x16x160xf32, #tpu.memory_space<vmem>>, vector<2x16x16xf32>
    tpu.vector_store %arg5[%c0_6, %c0_7, %c16], %2 {strides = array<i32>} : memref<2x16x160xf32, #tpu.memory_space<vmem>>, vector<2x16x16xf32>,
    %c0_8 = arith.constant 0 : index
    %c4 = arith.constant 4 : index
    %c0_9 = arith.constant 0 : index
    %4 = vector.load %arg1[%c0_8, %c4, %c0_9] : memref<2x24x16xf32, #tpu.memory_space<vmem>>, vector<2x16x16xf32>
    %c0_10 = arith.constant 0 : index
    %c0_11 = arith.constant 0 : index
    %c32 = arith.constant 32 : index
    %5 = vector.load %arg5[%c0_10, %c0_11, %c32] : memref<2x16x160xf32, #tpu.memory_space<vmem>>, vector<2x16x16xf32>
    tpu.vector_store %arg5[%c0_10, %c0_11, %c32], %4 {strides = array<i32>} : memref<2x16x160xf32, #tpu.memory_space<vmem>>, vector<2x16x16xf32>,
    %c0_12 = arith.constant 0 : index
    %c1 = arith.constant 1 : index
    %c0_13 = arith.constant 0 : index
    %6 = vector.load %arg1[%c0_12, %c1, %c0_13] : memref<2x24x16xf32, #tpu.memory_space<vmem>>, vector<2x16x16xf32>
    %c0_14 = arith.constant 0 : index
    %c0_15 = arith.constant 0 : index
    %c48 = arith.constant 48 : index
    %7 = vector.load %arg5[%c0_14, %c0_15, %c48] : memref<2x16x160xf32, #tpu.memory_space<vmem>>, vector<2x16x16xf32>
    tpu.vector_store %arg5[%c0_14, %c0_15, %c48], %6 {strides = array<i32>} : memref<2x16x160xf32, #tpu.memory_space<vmem>>, vector<2x16x16xf32>,
    %c0_16 = arith.constant 0 : index
    %c3_17 = arith.constant 3 : index
    %c0_18 = arith.constant 0 : index
    %8 = vector.load %arg1[%c0_16, %c3_17, %c0_18] : memref<2x24x16xf32, #tpu.memory_space<vmem>>, vector<2x16x16xf32>
    %c0_19 = arith.constant 0 : index
    %c0_20 = arith.constant 0 : index
    %c64 = arith.constant 64 : index
    %9 = vector.load %arg5[%c0_19, %c0_20, %c64] : memref<2x16x160xf32, #tpu.memory_space<vmem>>, vector<2x16x16xf32>
    tpu.vector_store %arg5[%c0_19, %c0_20, %c64], %8 {strides = array<i32>} : memref<2x16x160xf32, #tpu.memory_space<vmem>>, vector<2x16x16xf32>,
    %c0_21 = arith.constant 0 : index
    %c5 = arith.constant 5 : index
    %c0_22 = arith.constant 0 : index
    %10 = vector.load %arg1[%c0_21, %c5, %c0_22] : memref<2x24x16xf32, #tpu.memory_space<vmem>>, vector<2x16x16xf32>
    %c0_23 = arith.constant 0 : index
    %c0_24 = arith.constant 0 : index
    %c80 = arith.constant 80 : index
    %11 = vector.load %arg5[%c0_23, %c0_24, %c80] : memref<2x16x160xf32, #tpu.memory_space<vmem>>, vector<2x16x16xf32>
    tpu.vector_store %arg5[%c0_23, %c0_24, %c80], %10 {strides = array<i32>} : memref<2x16x160xf32, #tpu.memory_space<vmem>>, vector<2x16x16xf32>,
    %c0_25 = arith.constant 0 : index
    %c0_26 = arith.constant 0 : index
    %c0_27 = arith.constant 0 : index
    %12 = vector.load %arg1[%c0_25, %c0_26, %c0_27] : memref<2x24x16xf32, #tpu.memory_space<vmem>>, vector<2x16x16xf32>
    %c0_28 = arith.constant 0 : index
    %c0_29 = arith.constant 0 : index
    %c96 = arith.constant 96 : index
    %13 = vector.load %arg5[%c0_28, %c0_29, %c96] : memref<2x16x160xf32, #tpu.memory_space<vmem>>, vector<2x16x16xf32>
    tpu.vector_store %arg5[%c0_28, %c0_29, %c96], %12 {strides = array<i32>} : memref<2x16x160xf32, #tpu.memory_space<vmem>>, vector<2x16x16xf32>,
    %c0_30 = arith.constant 0 : index
    %c3_31 = arith.constant 3 : index
    %c0_32 = arith.constant 0 : index
    %14 = vector.load %arg1[%c0_30, %c3_31, %c0_32] : memref<2x24x16xf32, #tpu.memory_space<vmem>>, vector<2x16x16xf32>
    %c0_33 = arith.constant 0 : index
    %c0_34 = arith.constant 0 : index
    %c112 = arith.constant 112 : index
    %15 = vector.load %arg5[%c0_33, %c0_34, %c112] : memref<2x16x160xf32, #tpu.memory_space<vmem>>, vector<2x16x16xf32>
    tpu.vector_store %arg5[%c0_33, %c0_34, %c112], %14 {strides = array<i32>} : memref<2x16x160xf32, #tpu.memory_space<vmem>>, vector<2x16x16xf32>,
    %c0_35 = arith.constant 0 : index
    %c6 = arith.constant 6 : index
    %c0_36 = arith.constant 0 : index
    %16 = vector.load %arg1[%c0_35, %c6, %c0_36] : memref<2x24x16xf32, #tpu.memory_space<vmem>>, vector<2x16x16xf32>
    %c0_37 = arith.constant 0 : index
    %c0_38 = arith.constant 0 : index
    %c128 = arith.constant 128 : index
    %17 = vector.load %arg5[%c0_37, %c0_38, %c128] : memref<2x16x160xf32, #tpu.memory_space<vmem>>, vector<2x16x16xf32>
    tpu.vector_store %arg5[%c0_37, %c0_38, %c128], %16 {strides = array<i32>} : memref<2x16x160xf32, #tpu.memory_space<vmem>>, vector<2x16x16xf32>,
    %c0_39 = arith.constant 0 : index
    %c3_40 = arith.constant 3 : index
    %c0_41 = arith.constant 0 : index
    %18 = vector.load %arg1[%c0_39, %c3_40, %c0_41] : memref<2x24x16xf32, #tpu.memory_space<vmem>>, vector<2x16x16xf32>
    %c0_42 = arith.constant 0 : index
    %c0_43 = arith.constant 0 : index
    %c144 = arith.constant 144 : index
    %19 = vector.load %arg5[%c0_42, %c0_43, %c144] : memref<2x16x160xf32, #tpu.memory_space<vmem>>, vector<2x16x16xf32>
    tpu.vector_store %arg5[%c0_42, %c0_43, %c144], %18 {strides = array<i32>} : memref<2x16x160xf32, #tpu.memory_space<vmem>>, vector<2x16x16xf32>,
    %c0_44 = arith.constant 0 : index
    %c0_45 = arith.constant 0 : index
    %c0_46 = arith.constant 0 : index
    %20 = vector.load %arg5[%c0_44, %c0_45, %c0_46] : memref<2x16x160xf32, #tpu.memory_space<vmem>>, vector<2x16x160xf32>
    %21 = vector.shape_cast %20 : vector<2x16x160xf32> to vector<32x160xf32>
    %c0_47 = arith.constant 0 : index
    %c0_48 = arith.constant 0 : index
    %22 = vector.load %arg2[%c0_47, %c0_48] : memref<160x128xf32, #tpu.memory_space<vmem>>, vector<160x128xf32>
    %cst = arith.constant dense<0.000000e+00> : vector<32x128xf32>
    %23 = tpu.matmul %21, %22, %cst {dimension_numbers = #tpu.dot_dimension_numbers<[1], [0], [0], [1], [0, 0, 1, 1], [], []>} : vector<32x160xf32>, vector<160x128xf32>, vector<32x128xf32> -> vector<32x128xf32>
    %c4_49 = arith.constant 4 : index
    %c0_50 = arith.constant 0 : index
    %24 = vector.load %arg3[%c4_49, %c0_50] : memref<7x128xf32, #tpu.memory_space<vmem>>, vector<1x128xf32>
    %25 = vector.broadcast %24 : vector<1x128xf32> to vector<32x128xf32>
    %26 = arith.addf %23, %25 : vector<32x128xf32>
    %cst_51 = arith.constant 0.000000e+00 : f32
    %27 = vector.broadcast %cst_51 : f32 to vector<32x128xf32>
    %28 = arith.maximumf %26, %27 : vector<32x128xf32>
    %29 = vector.shape_cast %28 : vector<32x128xf32> to vector<2x16x128xf32>
    %cst_52 = arith.constant dense<0.000000e+00> : vector<2x128xf32>
    %30 = vector.multi_reduction <add>, %29, %cst_52 [1] : vector<2x16x128xf32> to vector<2x128xf32>
    %cst_53 = arith.constant 6.250000e-02 : f32
    %31 = vector.broadcast %cst_53 : f32 to vector<2x128xf32>
    %32 = arith.mulf %30, %31 : vector<2x128xf32>
    %c0_54 = arith.constant 0 : index
    %c0_55 = arith.constant 0 : index
    %33 = vector.load %arg3[%c0_54, %c0_55] : memref<7x128xf32, #tpu.memory_space<vmem>>, vector<2x128xf32>
    %c2_56 = arith.constant 2 : index
    %c0_57 = arith.constant 0 : index
    %34 = vector.load %arg3[%c2_56, %c0_57] : memref<7x128xf32, #tpu.memory_space<vmem>>, vector<2x128xf32>
    %c6_58 = arith.constant 6 : index
    %c0_59 = arith.constant 0 : index
    %35 = vector.load %arg3[%c6_58, %c0_59] : memref<7x128xf32, #tpu.memory_space<vmem>>, vector<1x2xf32>
    %c5_60 = arith.constant 5 : index
    %c0_61 = arith.constant 0 : index
    %36 = vector.load %arg3[%c5_60, %c0_61] : memref<7x128xf32, #tpu.memory_space<vmem>>, vector<1x128xf32>
    %cst_62 = arith.constant dense<0.000000e+00> : vector<2x2xf32>
    %37 = tpu.matmul %32, %33, %cst_62 {dimension_numbers = #tpu.dot_dimension_numbers<[1], [1], [0], [0], [0, 0, 1, 0], [], []>} : vector<2x128xf32>, vector<2x128xf32>, vector<2x2xf32> -> vector<2x2xf32>
    %38 = vector.broadcast %35 : vector<1x2xf32> to vector<2x2xf32>
    %39 = arith.addf %37, %38 : vector<2x2xf32>
    %cst_63 = arith.constant 0.000000e+00 : f32
    %40 = vector.broadcast %cst_63 : f32 to vector<2x2xf32>
    %41 = arith.maximumf %39, %40 : vector<2x2xf32>
    %cst_64 = arith.constant dense<0.000000e+00> : vector<2x128xf32>
    %42 = tpu.matmul %41, %34, %cst_64 {dimension_numbers = #tpu.dot_dimension_numbers<[1], [0], [0], [1], [0, 0, 1, 1], [], []>} : vector<2x2xf32>, vector<2x128xf32>, vector<2x128xf32> -> vector<2x128xf32>
    %43 = vector.broadcast %36 : vector<1x128xf32> to vector<2x128xf32>
    %44 = arith.addf %42, %43 : vector<2x128xf32>
    %45 = arith.negf %44 : vector<2x128xf32>
    %46 = math.exp %45 : vector<2x128xf32>
    %cst_65 = arith.constant 1.000000e+00 : f32
    %47 = vector.broadcast %cst_65 : f32 to vector<2x128xf32>
    %48 = arith.addf %47, %46 : vector<2x128xf32>
    %49 = arith.divf %47, %48 : vector<2x128xf32>
    %50 = vector.shape_cast %49 : vector<2x128xf32> to vector<2x1x128xf32>
    %51 = vector.broadcast %50 : vector<2x1x128xf32> to vector<2x16x128xf32>
    %52 = arith.mulf %29, %51 : vector<2x16x128xf32>
    %c0_66 = arith.constant 0 : index
    %c0_67 = arith.constant 0 : index
    %c0_68 = arith.constant 0 : index
    %53 = vector.load %arg4[%c0_66, %c0_67, %c0_68] : memref<2x16x128xf32, #tpu.memory_space<vmem>>, vector<2x16x128xf32>
    tpu.vector_store %arg4[%c0_66, %c0_67, %c0_68], %52 {strides = array<i32>} : memref<2x16x128xf32, #tpu.memory_space<vmem>>, vector<2x16x128xf32>,
    return
  }
  func.func @transform_0(%arg0: i32) -> (i32, i32, i32) {
    %c0_i32 = arith.constant 0 : i32
    %c0_i32_0 = arith.constant 0 : i32
    %c0_i32_1 = arith.constant 0 : i32
    return %arg0, %c0_i32, %c0_i32_0 : i32, i32, i32
  }
  func.func @transform_1(%arg0: i32) -> (i32, i32) {
    %c0_i32 = arith.constant 0 : i32
    %c0_i32_0 = arith.constant 0 : i32
    %c0_i32_1 = arith.constant 0 : i32
    return %c0_i32, %c0_i32_0 : i32, i32
  }
  func.func @transform_2(%arg0: i32) -> (i32, i32) {
    %c0_i32 = arith.constant 0 : i32
    %c0_i32_0 = arith.constant 0 : i32
    %c0_i32_1 = arith.constant 0 : i32
    return %c0_i32, %c0_i32_0 : i32, i32
  }
  func.func @transform_3(%arg0: i32) -> (i32, i32, i32) {
    %c0_i32 = arith.constant 0 : i32
    %c0_i32_0 = arith.constant 0 : i32
    %c0_i32_1 = arith.constant 0 : i32
    return %arg0, %c0_i32, %c0_i32_0 : i32, i32, i32
  }
}

</mosaic_0001>

<bundles_post_ra>
// kernel: tpu_custom_call.1
= control target key start
LH: loop header
LB: loop body
LE: loop exit
PB: predicated region body
PF: predicated region fallthrough
CT: control target
= control target key end

     0   :  { %8 = vsyncpa [#allocation4], 0  ;;  %s1067_s0 = inlined_call_operand.vmem [shape: f32[2,24,16], index: 0, kind: input, shape index: {}]   ;;  %s1068_s1 = inlined_call_operand.hbm [shape: f32[160,128], index: 1, kind: input, shape index: {}]   ;;  %s1069_s2 = inlined_call_operand.vmem [shape: f32[7,128], index: 2, kind: input, shape index: {}]   ;;  %s1070_s3 = inlined_call_operand.hbm [shape: f32[2,16,128], index: 3, kind: output, shape index: {}]  }
   0x1   :  { %9 = vsyncpa [#allocation5], 0  ;;  %s767_s12 = smov [#allocation3]   ;;  %s719_s16 = scalar_lea.hbm %s1068_s1, 2560 }
   0x2   :  { %s17_s13 = sshll.u32 %s767_s12, 4  ;;  %p720_p0 = scmp.ne.s32.totalorder %s1068_s1, %s719_s16  ;;  %s18_s13 = int_to_ptr.vmem [resolvable:$true] %s17_s13 }
   0x3   :  { %p723_p1 = scmp.lt.u32.totalorder %s719_s16, %s1068_s1 }
   0x5   :  { %p725_p2 = pnand %p723_p1, %p720_p0 }
   0x7   :  { %728 = shalt.err (!%p725_p2)
}
   0x8   :  { %s729_s21 = scalar_lea.vmem %s18_s13, 2560  ;;  %p734_p4 = scmp.lt.s32.totalorder %s18_s13, %s18_s13 }
   0x9   :  { %p730_p3 = scmp.ne.s32.totalorder %s18_s13, %s729_s21  ;;  %p735_p5 = scmp.lt.s32.totalorder %s729_s21, %s729_s21 }
   0xb   :  { %p736_p6 = por %p735_p5, %p734_p4 }
   0xd   :  { %p737_p7 = pnand %p736_p6, %p730_p3 }
   0xf   :  { %740 = shalt.err (!%p737_p7)
}
  0x10   :  { %s768_s22 = smov 128   ;;  %s769_s23 = smov 8  }
  0x11   :  { %23 = dma.hbm_to_vmem [thread:$0]  %s1068_s1, 2560, %s18_s13, [#allocation4], %s768_s22, %s768_s22, %s769_s23  }
  0x12   :  { %763 = dma.done.wait [#allocation4], 2560  }
  0x13   :  { %764 = vsyncadd [#allocation4], 4294964736  ;;  %v770_v0 = vmov 0.0|0.0   ;;  %v88_v1 = vld [vmem:[%s1067_s0 + $0x1] sm:$0xff]  ;;  %s771_s30 = smov 48   ;;  %s772_s1 = smov 16  }
  0x14   :  { %650 = vmatprep.subr.bf16.mxu0 %v770_v0  ;;  %680 = vmatprep.subr.bf16.mxu1 %v770_v0  ;;  %v825_v2 = vld [vmem:[%s1067_s0 + $0x3] sm:$0xff]  ;;  %v253_v4 = vld [vmem:[#allocation3] sm:$0xff]  ;;  %s773_s6 = smov 64   ;;  %s774_s7 = smov 32   ;;  %v254_v5 = vld [vmem:[#allocation3 + $0x8] sm:$0xff]  ;;  %vm33_vm0 = vcmask 130048  }
  0x15   :  { %96 = vrot.lane.b32.xlu1 %v88_v1, %s771_s30  ;;  %46 = vrot.lane.b32.xlu0 %v825_v2, %s772_s1  ;;  %v63_v3 = vld [vmem:[%s1067_s0 + $0x4] sm:$0xff]  ;;  %v651_v8 = vpack.c.bf16 %v254_v5, %v253_v4  ;;  %s775_s14 = smov 80   ;;  %v257_v13 = vld [vmem:[#allocation3 + $0x20] sm:$0xff]  ;;  %v258_v14 = vld [vmem:[#allocation3 + $0x28] sm:$0xff]  ;;  %s776_s25 = smov 96   ;;  %vm58_vm1 = vcmask 261248  }
  0x16   :  { %v138_v6 = vld [vmem:[%s1067_s0 + $0x5] sm:$0xff]  ;;  %v657_v18 = vpack.c.bf16 %v258_v14, %v257_v13  ;;  %v31_v24 = vld [vmem:[%s1067_s0 + $0x1a] sm:$0xff]  ;;  %v261_v26 = vld [vmem:[#allocation3 + $0x40] sm:$0xff]  ;;  %s777_s8 = smov 112   ;;  %vm83_vm2 = vcmask 392448   ;;  %vm108_vm3 = vcmask 523648  }
  0x17   :  { %v842_v7 = vld [vmem:[%s1067_s0 + $0xb] sm:$0xff]  ;;  %v255_v9 = vld [vmem:[#allocation3 + $0x10] sm:$0xff]  ;;  %652 = vmatpush1.bf16.msra.mxu0 %v651_v8  ;;  %690 = vmatpush1.bf16.msra.mxu1 %v651_v8  ;;  %36 = vst.msk [vmem:[#allocation2 + $0x20] sm:$0xff] %vm33_vm0, %v31_v24  ;;  %v262_v27 = vld [vmem:[#allocation3 + $0x48] sm:$0xff]  ;;  %vm133_vm4 = vcmask 654848   ;;  %vm158_vm5 = vcmask 786048  }
  0x18   :  { %v256_v10 = vld [vmem:[#allocation3 + $0x18] sm:$0xff]  ;;  %v163_v15 = vld [vmem:[%s1067_s0] sm:$0xff]  ;;  %653 = vmatprep.subr.bf16.mxu0 %v770_v0  ;;  %681 = vmatprep.subr.bf16.mxu1 %v770_v0  ;;  %v663_v28 = vpack.c.bf16 %v262_v27, %v261_v26  ;;  %v265_v35 = vld [vmem:[#allocation3 + $0x60] sm:$0xff]  ;;  %vm183_vm6 = vcmask 917248   ;;  %vm208_vm7 = vcmask 1048448   ;;  %vm278_vm8 = vcmask 261120  }
  0x19   :  { %121 = vrot.lane.b32.xlu1 %v825_v2, %s773_s6  ;;  %71 = vrot.lane.b32.xlu0 %v63_v3, %s774_s7  ;;  %v654_v11 = vpack.c.bf16 %v256_v10, %v255_v9  ;;  %v29_v12 = vld [vmem:[%s1067_s0 + $0x2] sm:$0xff]  ;;  %v64_v16 = vld [vmem:[%s1067_s0 + $0xc] sm:$0xff]  ;;  %v266_v36 = vld [vmem:[#allocation3 + $0x68] sm:$0xff]  ;;  %vm779_vm9 = vmmov 0   ;;  %vm406_vm10 = vcmask 1041409   ;;  %vm488_vm11 = vcmask 1041408  }
  0x1a   :  { %34 = vst.msk [vmem:[#allocation2] sm:$0xff] %vm33_vm0, %v29_v12  ;;  %v30_v17 = vld [vmem:[%s1067_s0 + $0xa] sm:$0xff]  ;;  %v259_v20 = vld [vmem:[#allocation3 + $0x30] sm:$0xff]  ;;  %v669_v39 = vpack.c.bf16 %v266_v36, %v265_v35  ;;  %v270_v46 = vld [vmem:[#allocation3 + $0x88] sm:$0xff]  ;;  %v778_v36 = vmov 0.0   ;;  %vm484_vm12 = vcmask 15360  }
  0x1b   :  { %35 = vst.msk [vmem:[#allocation2 + $0x10] sm:$0xff] %vm33_vm0, %v30_v17  ;;  %655 = vmatpush1.bf16.msra.mxu0 %v654_v11  ;;  %v213_v19 = vld [vmem:[%s1067_s0 + $0x6] sm:$0xff]  ;;  %691 = vmatpush1.bf16.msra.mxu1 %v654_v11  ;;  %v899_v32 = vld [vmem:[%s1067_s0 + $0x1b] sm:$0xff]  ;;  %v214_v33 = vld [vmem:[%s1067_s0 + $0xe] sm:$0xff] }
  0x1c   :  { %v260_v21 = vld [vmem:[#allocation3 + $0x38] sm:$0xff]  ;;  %217 = vst.msk [vmem:[#allocation2 + $0x8] sm:$0xff] %vm33_vm0, %v213_v19  ;;  %656 = vmatprep.subr.bf16.mxu0 %v770_v0  ;;  %682 = vmatprep.subr.bf16.mxu1 %v770_v0  ;;  %v263_v29 = vld [vmem:[#allocation3 + $0x50] sm:$0xff]  ;;  %218 = vst.msk [vmem:[#allocation2 + $0x18] sm:$0xff] %vm33_vm0, %v214_v33 }
  0x1d   :  { %146 = vrot.lane.b32.xlu1 %v138_v6, %s775_s14  ;;  %48 = vrot.lane.b32.xlu0 %v842_v7, %s772_s1  ;;  %v32_v22 = vld [vmem:[%s1067_s0 + $0x22] sm:$0xff]  ;;  %v660_v25 = vpack.c.bf16 %v260_v21, %v259_v20  ;;  %v139_v38 = vld [vmem:[%s1067_s0 + $0xd] sm:$0xff] }
  0x1e   :  { %v89_v23 = vld [vmem:[%s1067_s0 + $0x9] sm:$0xff]  ;;  %37 = vst.msk [vmem:[#allocation2 + $0x30] sm:$0xff] %vm33_vm0, %v32_v22  ;;  %v65_v37 = vld [vmem:[%s1067_s0 + $0x1c] sm:$0xff] }
  0x1f   :  { %658 = vmatpush1.bf16.msra.mxu0 %v657_v18  ;;  %692 = vmatpush1.bf16.msra.mxu1 %v657_v18  ;;  %v264_v30 = vld [vmem:[#allocation3 + $0x58] sm:$0xff]  ;;  %v267_v40 = vld [vmem:[#allocation3 + $0x70] sm:$0xff]  ;;  %v269_v45 = vld [vmem:[#allocation3 + $0x80] sm:$0xff] }
  0x20   :  { %659 = vmatprep.subr.bf16.mxu0 %v770_v0  ;;  %683 = vmatprep.subr.bf16.mxu1 %v770_v0  ;;  %v894_v31 = vld [vmem:[%s1067_s0 + $0x23] sm:$0xff]  ;;  %v666_v34 = vpack.c.bf16 %v264_v30, %v263_v29  ;;  %v90_v47 = vld [vmem:[%s1067_s0 + $0x19] sm:$0xff]  ;;  %v675_v48 = vpack.c.bf16 %v270_v46, %v269_v45 }
  0x21   :  { %171 = vrot.lane.b32.xlu1 %v163_v15, %s776_s25  ;;  %73 = vrot.lane.b32.xlu0 %v64_v16, %s774_s7  ;;  %v268_v41 = vld [vmem:[#allocation3 + $0x78] sm:$0xff]  ;;  %v271_v49 = vld [vmem:[#allocation3 + $0x90] sm:$0xff]  ;;  %v165_v58 = vld [vmem:[%s1067_s0 + $0x18] sm:$0xff] }
  0x22   :  { %v164_v42 = vld [vmem:[%s1067_s0 + $0x8] sm:$0xff]  ;;  %v672_v44 = vpack.c.bf16 %v268_v41, %v267_v40  ;;  %v215_v54 = vld [vmem:[%s1067_s0 + $0x1e] sm:$0xff] }
  0x23   :  { %661 = vmatpush1.bf16.msra.mxu0 %v660_v25  ;;  %693 = vmatpush1.bf16.msra.mxu1 %v660_v25  ;;  %v66_v43 = vld [vmem:[%s1067_s0 + $0x24] sm:$0xff]  ;;  %219 = vst.msk [vmem:[#allocation2 + $0x28] sm:$0xff] %vm33_vm0, %v215_v54  ;;  %v396_v35 = vld [vmem:[%s1069_s2] sm:$0x3] }
  0x24   :  { %662 = vmatprep.subr.bf16.mxu0 %v770_v0  ;;  %684 = vmatprep.subr.bf16.mxu1 %v770_v0  ;;  %v272_v50 = vld [vmem:[#allocation3 + $0x98] sm:$0xff]  ;;  %v140_v56 = vld [vmem:[%s1067_s0 + $0x1d] sm:$0xff] }
  0x25   :  { %98 = vrot.lane.b32.xlu1 %v89_v23, %s771_s30  ;;  %229 = vrot.lane.b32.xlu0 %v825_v2, %s772_s1  ;;  %v91_v51 = vld [vmem:[%s1067_s0 + $0x21] sm:$0xff]  ;;  %v678_v52 = vpack.c.bf16 %v272_v50, %v271_v49 }
  0x26   :  { %v216_v53 = vld [vmem:[%s1067_s0 + $0x26] sm:$0xff]  ;;  %v626_v41 = vld [vmem:[%s1069_s2 + $0x4] ss:$0 sm:$0xff] }
  0x27   :  { %664 = vmatpush1.bf16.msra.mxu0 %v663_v28  ;;  %694 = vmatpush1.bf16.msra.mxu1 %v663_v28  ;;  %220 = vst.msk [vmem:[#allocation2 + $0x38] sm:$0xff] %vm33_vm0, %v216_v53  ;;  %v141_v55 = vld [vmem:[%s1067_s0 + $0x25] sm:$0xff] }
  0x28   :  { %665 = vmatprep.subr.bf16.mxu0 %v770_v0  ;;  %685 = vmatprep.subr.bf16.mxu1 %v770_v0  ;;  %v166_v57 = vld [vmem:[%s1067_s0 + $0x20] sm:$0xff] }
  0x29   :  { %123 = vrot.lane.b32.xlu1 %v842_v7, %s773_s6  ;;  %196 = vrot.lane.b32.xlu0 %v825_v2, %s777_s8 }
  0x2b   :  { %667 = vmatpush1.bf16.msra.mxu0 %v666_v34  ;;  %695 = vmatpush1.bf16.msra.mxu1 %v666_v34 }
  0x2c   :  { %668 = vmatprep.subr.bf16.mxu0 %v770_v0  ;;  %686 = vmatprep.subr.bf16.mxu1 %v770_v0 }
  0x2d   :  { %52 = vrot.lane.b32.xlu1 %v894_v31, %s772_s1  ;;  %50 = vrot.lane.b32.xlu0 %v899_v32, %s772_s1 }
  0x2f   :  { %670 = vmatpush1.bf16.msra.mxu0 %v669_v39  ;;  %696 = vmatpush1.bf16.msra.mxu1 %v669_v39 }
  0x30   :  { %671 = vmatprep.subr.bf16.mxu0 %v770_v0  ;;  %687 = vmatprep.subr.bf16.mxu1 %v770_v0 }
  0x31   :  { %75 = vrot.lane.b32.xlu1 %v65_v37, %s774_s7  ;;  %148 = vrot.lane.b32.xlu0 %v139_v38, %s775_s14 }
  0x33   :  { %673 = vmatpush1.bf16.msra.mxu0 %v672_v44  ;;  %697 = vmatpush1.bf16.msra.mxu1 %v672_v44 }
  0x34   :  { %674 = vmatprep.subr.bf16.mxu0 %v770_v0  ;;  %688 = vmatprep.subr.bf16.mxu1 %v770_v0 }
  0x35   :  { %173 = vrot.lane.b32.xlu1 %v164_v42, %s776_s25  ;;  %77 = vrot.lane.b32.xlu0 %v66_v43, %s774_s7 }
  0x37   :  { %676 = vmatpush1.bf16.msra.mxu0 %v675_v48  ;;  %698 = vmatpush1.bf16.msra.mxu1 %v675_v48 }
  0x38   :  { %677 = vmatprep.subr.bf16.mxu0 %v770_v0  ;;  %689 = vmatprep.subr.bf16.mxu1 %v770_v0 }
  0x39   :  { %100 = vrot.lane.b32.xlu1 %v90_v47, %s771_s30  ;;  %231 = vrot.lane.b32.xlu0 %v842_v7, %s772_s1 }
  0x3b   :  { %679 = vmatpush1.bf16.msra.mxu0 %v678_v52  ;;  %699 = vmatpush1.bf16.msra.mxu1 %v678_v52 }
  0x3c   :  { %640 = vmatprep.subr.mxu1 %v778_v36 }
  0x3d   :  { %198 = vrot.lane.b32.xlu1 %v842_v7, %s777_s8  ;;  %102 = vrot.lane.b32.xlu0 %v91_v51, %s771_s30 }
  0x41   :  { %127 = vrot.lane.b32.xlu1 %v894_v31, %s773_s6  ;;  %125 = vrot.lane.b32.xlu0 %v899_v32, %s773_s6 }
  0x45   :  { %152 = vrot.lane.b32.xlu1 %v141_v55, %s775_s14  ;;  %150 = vrot.lane.b32.xlu0 %v140_v56, %s775_s14 }
  0x49   :  { %177 = vrot.lane.b32.xlu1 %v166_v57, %s776_s25  ;;  %175 = vrot.lane.b32.xlu0 %v165_v58, %s776_s25 }
  0x4d   :  { %235 = vrot.lane.b32.xlu1 %v894_v31, %s772_s1  ;;  %233 = vrot.lane.b32.xlu0 %v899_v32, %s772_s1 }
  0x51   :  { %202 = vrot.lane.b32.xlu1 %v894_v31, %s777_s8  ;;  %200 = vrot.lane.b32.xlu0 %v899_v32, %s777_s8 }
  0x87   :  { %v97_v59 = vpop.permute.xlu1 %96  ;;  %v47_v60 = vpop.permute.xlu0 %46 }
  0x88   :  { %59 = vst.msk [vmem:[#allocation2] sm:$0xff] %vm58_vm1, %v47_v60 }
  0x8b   :  { %v122_v61 = vpop.permute.xlu1 %121  ;;  %v72_v62 = vpop.permute.xlu0 %71 }
  0x8c   :  { %84 = vst.msk [vmem:[#allocation2] sm:$0xff] %vm83_vm2, %v72_v62 }
  0x8d   :  { %109 = vst.msk [vmem:[#allocation2] sm:$0xff] %vm108_vm3, %v97_v59 }
  0x8e   :  { %134 = vst.msk [vmem:[#allocation2] sm:$0xff] %vm133_vm4, %v122_v61 }
  0x8f   :  { %v147_v63 = vpop.permute.xlu1 %146  ;;  %v49_v0 = vpop.permute.xlu0 %48 }
  0x90   :  { %159 = vst.msk [vmem:[#allocation2] sm:$0xff] %vm158_vm5, %v147_v63 }
  0x91   :  { %60 = vst.msk [vmem:[#allocation2 + $0x10] sm:$0xff] %vm58_vm1, %v49_v0 }
  0x93   :  { %v172_v1 = vpop.permute.xlu1 %171  ;;  %v74_v2 = vpop.permute.xlu0 %73 }
  0x94   :  { %184 = vst.msk [vmem:[#allocation2] sm:$0xff] %vm183_vm6, %v172_v1 }
  0x95   :  { %85 = vst.msk [vmem:[#allocation2 + $0x10] sm:$0xff] %vm83_vm2, %v74_v2 }
  0x97   :  { %v99_v3 = vpop.permute.xlu1 %98  ;;  %v230_v4 = vpop.permute.xlu0 %229 }
  0x98   :  { %110 = vst.msk [vmem:[#allocation2 + $0x10] sm:$0xff] %vm108_vm3, %v99_v3 }
  0x99   :  { %241 = vst.msk [vmem:[#allocation2 + $0x8] sm:$0xff] %vm58_vm1, %v230_v4 }
  0x9b   :  { %v124_v5 = vpop.permute.xlu1 %123  ;;  %v197_v6 = vpop.permute.xlu0 %196 }
  0x9c   :  { %135 = vst.msk [vmem:[#allocation2 + $0x10] sm:$0xff] %vm133_vm4, %v124_v5 }
  0x9d   :  { %209 = vst.msk [vmem:[#allocation2] sm:$0xff] %vm208_vm7, %v197_v6 }
  0x9f   :  { %v53_v7 = vpop.permute.xlu1 %52  ;;  %v51_v8 = vpop.permute.xlu0 %50 }
  0xa0   :  { %v246_v9 = vld [vmem:[#allocation2 + $0x8] sm:$0xff]  ;;  %62 = vst.msk [vmem:[#allocation2 + $0x30] sm:$0xff] %vm58_vm1, %v53_v7  ;;  %61 = vst.msk [vmem:[#allocation2 + $0x20] sm:$0xff] %vm58_vm1, %v51_v8  ;;  %v397_v7 = vld [vmem:[%s1069_s2 + $0x2] sm:$0x3] }
  0xa1   :  { %627 = vmatprep.mubr.msk.f32.mxu0 %vm278_vm8, %v246_v9  ;;  %v631_v8 = vld [vmem:[%s1069_s2 + $0x6] ss:$0 sm:$0xff] }
  0xa3   :  { %v76_v10 = vpop.permute.xlu1 %75  ;;  %v149_v11 = vpop.permute.xlu0 %148 }
  0xa4   :  { %v245_v12 = vld [vmem:[#allocation2] sm:$0xff]  ;;  %86 = vst.msk [vmem:[#allocation2 + $0x20] sm:$0xff] %vm83_vm2, %v76_v10 }
  0xa5   :  { %160 = vst.msk [vmem:[#allocation2 + $0x10] sm:$0xff] %vm158_vm5, %v149_v11  ;;  %356 = vmatmul.mubr.f32.vlgmr.msra.gmra.mrb[0].mxu0 %v245_v12 }
  0xa7   :  { %v174_v13 = vpop.permute.xlu1 %173  ;;  %v78_v14 = vpop.permute.xlu0 %77 }
  0xa8   :  { %185 = vst.msk [vmem:[#allocation2 + $0x10] sm:$0xff] %vm183_vm6, %v174_v13  ;;  %v632_v13 = vld [vmem:[%s1069_s2 + $0x5] ss:$0 sm:$0xff]  ;;  %s781_s2 = smov [#allocation6]  }
  0xa9   :  { %87 = vst.msk [vmem:[#allocation2 + $0x30] sm:$0xff] %vm83_vm2, %v78_v14  ;;  %s614_s26 = sshll.u32 %s781_s2, 4  ;;  %s615_s26 = int_to_ptr.vmem [resolvable:$true] %s614_s26 }
  0xaa   :  { %s741_s27 = scalar_lea.vmem %s615_s26, 512  ;;  %p746_p9 = scmp.lt.s32.totalorder %s615_s26, %s615_s26 }
  0xab   :  { %v101_v15 = vpop.permute.xlu1 %100  ;;  %v232_v16 = vpop.permute.xlu0 %231  ;;  %p742_p8 = scmp.ne.s32.totalorder %s615_s26, %s741_s27  ;;  %p747_p10 = scmp.lt.s32.totalorder %s741_s27, %s741_s27 }
  0xac   :  { %111 = vst.msk [vmem:[#allocation2 + $0x20] sm:$0xff] %vm108_vm3, %v101_v15 }
  0xad   :  { %242 = vst.msk [vmem:[#allocation2 + $0x18] sm:$0xff] %vm58_vm1, %v232_v16  ;;  %p748_p11 = por %p747_p10, %p746_p9 }
  0xaf   :  { %v199_v17 = vpop.permute.xlu1 %198  ;;  %v103_v18 = vpop.permute.xlu0 %102  ;;  %p749_p12 = pnand %p748_p11, %p742_p8 }
  0xb0   :  { %210 = vst.msk [vmem:[#allocation2 + $0x10] sm:$0xff] %vm208_vm7, %v199_v17 }
  0xb1   :  { %112 = vst.msk [vmem:[#allocation2 + $0x30] sm:$0xff] %vm108_vm3, %v103_v18 }
  0xb3   :  { %v128_v19 = vpop.permute.xlu1 %127  ;;  %v126_v20 = vpop.permute.xlu0 %125 }
  0xb4   :  { %v248_v21 = vld [vmem:[#allocation2 + $0x18] sm:$0xff]  ;;  %137 = vst.msk [vmem:[#allocation2 + $0x30] sm:$0xff] %vm133_vm4, %v128_v19  ;;  %136 = vst.msk [vmem:[#allocation2 + $0x20] sm:$0xff] %vm133_vm4, %v126_v20  ;;  %v780_v20 = vmov 1966171168  }
  0xb5   :  { %628 = vmatprep.mubr.msk.f32.mxu0 %vm278_vm8, %v248_v21  ;;  %v570_v21 = vunpack.c.l.s4 %v780_v20 }
  0xb7   :  { %v153_v22 = vpop.permute.xlu1 %152  ;;  %v151_v23 = vpop.permute.xlu0 %150  ;;  %v247_v24 = vld [vmem:[#allocation2 + $0x10] sm:$0xff] }
  0xb8   :  { %162 = vst.msk [vmem:[#allocation2 + $0x30] sm:$0xff] %vm158_vm5, %v153_v22  ;;  %161 = vst.msk [vmem:[#allocation2 + $0x20] sm:$0xff] %vm158_vm5, %v151_v23  ;;  %361 = vmatmul.mubr.f32.gmra.mrb[2].mxu0 %v247_v24  ;;  %v572_v22 = vlaneseq  ;;  %v571_v23 = vunpack.c.0.s8 %v570_v21 }
  0xba   :  { %v573_v24 = vshrl.u32 %v572_v22, 7 }
  0xbb   :  { %v178_v25 = vpop.permute.xlu1 %177  ;;  %v176_v26 = vpop.permute.xlu0 %175 }
  0xbc   :  { %187 = vst.msk [vmem:[#allocation2 + $0x30] sm:$0xff] %vm183_vm6, %v178_v25  ;;  %186 = vst.msk [vmem:[#allocation2 + $0x20] sm:$0xff] %vm183_vm6, %v176_v26  ;;  %v574_v25 = vsub.s32 %v571_v23, %v573_v24 }
  0xbf   :  { %v236_v27 = vpop.permute.xlu1 %235  ;;  %v234_v28 = vpop.permute.xlu0 %233 }
  0xc0   :  { %244 = vst.msk [vmem:[#allocation2 + $0x38] sm:$0xff] %vm58_vm1, %v236_v27  ;;  %243 = vst.msk [vmem:[#allocation2 + $0x28] sm:$0xff] %vm58_vm1, %v234_v28  ;;  %v593_v28 = vsub.s32 0, %v573_v24 }
  0xc3   :  { %v203_v29 = vpop.permute.xlu1 %202  ;;  %v201_v30 = vpop.permute.xlu0 %200 }
  0xc4   :  { %212 = vst.msk [vmem:[#allocation2 + $0x30] sm:$0xff] %vm208_vm7, %v203_v29  ;;  %211 = vst.msk [vmem:[#allocation2 + $0x20] sm:$0xff] %vm208_vm7, %v201_v30 }
  0xc7   :  { %v250_v31 = vld [vmem:[#allocation2 + $0x28] sm:$0xff]  ;;  %v252_v32 = vld [vmem:[#allocation2 + $0x38] sm:$0xff] }
  0xc8   :  { %629 = vmatprep.mubr.msk.f32.mxu0 %vm278_vm8, %v250_v31  ;;  %630 = vmatprep.mubr.msk.f32.mxu1 %vm278_vm8, %v252_v32 }
  0xcb   :  { %v249_v33 = vld [vmem:[#allocation2 + $0x20] sm:$0xff]  ;;  %v251_v34 = vld [vmem:[#allocation2 + $0x30] sm:$0xff] }
  0xcc   :  { %366 = vmatmul.mubr.f32.gmra.mrb[4].mxu0 %v249_v33  ;;  %371 = vmatmul.mubr.f32.vlgmr.msra.gmra.mrb[0].mxu1 %v251_v34 }
  0xcd   :  { %642 = vmatprep.mubr.msk.f32.mxu1 %vm779_vm9, %v778_v36  ;;  %641 = vmatpush3.xpose.msra.mxu1 %v396_v35 }
  0xce   :  { %645 = vmatprep.subr.mxu1 %v778_v36 }
 0x178   :  { %v357_v37 = vpop.f32.mrb[0].mxu0 }
 0x179   :  { %v359_v38 = vpop.f32.mrb[1].mxu0  ;;  %v1030_v43 = vadd.f32 %v626_v41, %v357_v37 }
 0x17b   :  { %v376_v45 = vmax.f32 %v1030_v43, 0.0 }
 0x18b   :  { %v362_v39 = vpop.f32.mrb[2].mxu0 }
 0x18c   :  { %v364_v40 = vpop.f32.mrb[3].mxu0  ;;  %v1028_v42 = vadd.f32 %v626_v41, %v362_v39 }
 0x18e   :  { %v377_v44 = vmax.f32 %v1028_v42, 0.0 }
 0x190   :  { %v380_v46 = vadd.f32 %v377_v44, %v376_v45 }
 0x192   :  { %v381_v47 = vrot.slane %v380_v46, 4 }
 0x194   :  { %v382_v48 = vadd.f32 %v381_v47, %v380_v46 }
 0x196   :  { %v383_v55 = vrot.slane %v382_v48, 2 }
 0x198   :  { %v384_v59 = vadd.f32 %v383_v55, %v382_v48 }
 0x19a   :  { %v385_v62 = vrot.slane %v384_v59, 1 }
 0x19c   :  { %v386_v2 = vadd.f32 %v385_v62, %v384_v59 }
 0x19e   :  { %v394_v4 = vmul.f32 0.0625, %v386_v2 }
 0x19f   :  { %v367_v49 = vpop.f32.mrb[4].mxu0  ;;  %v372_v50 = vpop.f32.mrb[0].mxu1 }
 0x1a0   :  { %v368_v51 = vadd.f32 %v626_v41, %v367_v49  ;;  %v373_v52 = vadd.f32 %v626_v41, %v372_v50  ;;  %v369_v53 = vpop.f32.mrb[5].mxu0  ;;  %v374_v54 = vpop.f32.mrb[1].mxu1 }
 0x1a2   :  { %v378_v56 = vmax.f32 %v368_v51, 0.0  ;;  %v379_v57 = vmax.f32 %v373_v52, 0.0 }
 0x1a4   :  { %v387_v58 = vadd.f32 %v379_v57, %v378_v56 }
 0x1a6   :  { %v388_v60 = vrot.slane %v387_v58, 4 }
 0x1a8   :  { %v389_v61 = vadd.f32 %v388_v60, %v387_v58 }
 0x1aa   :  { %v390_v63 = vrot.slane %v389_v61, 2 }
 0x1ac   :  { %v391_v0 = vadd.f32 %v390_v63, %v389_v61 }
 0x1ae   :  { %v392_v1 = vrot.slane %v391_v0, 1 }
 0x1b0   :  { %v393_v3 = vadd.f32 %v392_v1, %v391_v0 }
 0x1b2   :  { %v395_v5 = vmul.f32 0.0625, %v393_v3 }
 0x1b4   :  { %v407_v6 = vsel %vm406_vm10, %v395_v5, %v394_v4 }
 0x1b5   :  { %643 = vmatmul.mubr.f32.vlgmr.msra.gmra.mrb[2].mxu1 %v407_v6 }
 0x1b6   :  { %647 = vmatprep.mubr.msk.f32.mxu1 %vm779_vm9, %v778_v36  ;;  %646 = vmatpush3.msk.msra.mxu1 %vm488_vm11, %v397_v7 }
 0x288   :  { %v475_v9 = vpop.f32.mrb[2].mxu1 }
 0x289   :  { %v476_v10 = vadd.f32 %v631_v8, %v475_v9  ;;  %v644_v11 = vpop.f32.mrb[3].mxu1 }
 0x28b   :  { %v479_v12 = vmax.f32 %v476_v10, 0.0 }
 0x28d   :  { %648 = vmatmul.mubr.msk.f32.vlgmr.msra.gmra.mrb[4].mxu1 %vm484_vm12, %v479_v12 }
 0x360   :  { %v558_v14 = vpop.f32.mrb[4].mxu1 }
 0x361   :  { %v559_v15 = vadd.f32 %v632_v13, %v558_v14  ;;  %v649_v16 = vpop.f32.mrb[5].mxu1 }
 0x363   :  { %v635_v17 = vmul.f32 -1.442695, %v559_v15 }
 0x365   :  { %715 = vpow2.f32 %v635_v17 }
 0x36f   :  { %v716_v18 = vpop.eup %715 }
 0x370   :  { %v565_v19 = vadd.f32 1.0, %v716_v18 }
 0x372   :  { %717 = vrcp.f32 %v565_v19 }
 0x37c   :  { %v718_v26 = vpop.eup %717 }
 0x37d   :  { %v575_v27 = vrot.slane %v718_v26, %v574_v25 }
 0x37f   :  { %v576_v29 = vcombine.high %v575_v27, %v575_v27  ;;  %v583_v30 = vrot.slane %v575_v27, %v574_v25 }
 0x381   :  { %v590_v31 = vrot.slane %v576_v29, %v574_v25  ;;  %v594_v32 = vrot.slane %v583_v30, %v593_v28 }
 0x383   :  { %v598_v33 = vrot.slane %v590_v31, %v593_v28  ;;  %v601_v34 = vmul.f32 %v594_v32, %v376_v45  ;;  %v602_v35 = vmul.f32 %v594_v32, %v377_v44 }
 0x385   :  { %v603_v36 = vmul.f32 %v598_v33, %v378_v56  ;;  %v604_v37 = vmul.f32 %v598_v33, %v379_v57  ;;  %605 = vst [vmem:[#allocation6] sm:$0xff] %v601_v34  ;;  %606 = vst [vmem:[#allocation6 + $0x8] sm:$0xff] %v602_v35 }
 0x387   :  { %607 = vst [vmem:[#allocation6 + $0x10] sm:$0xff] %v603_v36  ;;  %608 = vst [vmem:[#allocation6 + $0x18] sm:$0xff] %v604_v37 }
 0x388   :  { %752 = shalt.err (!%p749_p12)
}
 0x389   :  { %s753_s29 = scalar_lea.hbm %s1070_s3, 512 }
 0x38a   :  { %p754_p13 = scmp.ne.s32.totalorder %s1070_s3, %s753_s29  ;;  %p757_p0 = scmp.lt.u32.totalorder %s753_s29, %s1070_s3 }
 0x38c   :  { %p759_p1 = pnand %p757_p0, %p754_p13 }
 0x38e   :  { %762 = shalt.err (!%p759_p1)
}
 0x38f   :  { %620 = dma.vmem_to_hbm [thread:$0]  %s615_s26, 512, %s1070_s3, [#allocation5], %s768_s22, %s768_s22, %s769_s23  }
 0x390   :  { %765 = dma.done.wait [#allocation5], 512  }
 0x391   :  { %766 = vsyncadd [#allocation5], 4294966784 }
 0x392   :  { %624 = vsyncpa [#allocation4], 1 }
 0x393   :  { %625 = vsyncpa [#allocation5], 1 }

</bundles_post_ra>
